<compile_context>
chip_gen: v7x
topology: tpu7x:2x2x1
jax: 0.10.0
libtpu: 0.0.40
codegen_flags: <defaults>
</compile_context>

<pallas_src>
import jax
import jax.numpy as jnp
from jax import lax
from jax.experimental import pallas as pl
from jax.experimental.pallas import tpu as pltpu


def _rnn_recurrence_kernel(proj_ref, h0_ref, whh_ref, hid_ref):
    """Serial part only: h_t = tanh(proj_t + h_{t-1} @ W_hh^T).

    proj_ref : (chunk_t, B_pad, H) f32  time-major, lane-dense input projection
    h0_ref   : (B_pad, H)          f32  initial hidden state
    whh_ref  : (H, H)              f32  W_hh^T (so the dot is h @ W_hh^T)
    hid_ref  : (B_pad, H)          f32  VMEM-resident recurrent state / output
    """
    c = pl.program_id(0)

    # Seed the VMEM-resident recurrent state (constant-index output block)
    # from the provided initial hidden on the first time chunk.
    @pl.when(c == 0)
    def _():
        hid_ref[...] = h0_ref[...]

    chunk_t = proj_ref.shape[0]

    def step(t, h):
        # Leading-axis (time-major) slice: no cross-vreg shuffles on the
        # serial critical path.  W_hh is read from VMEM each iteration so the
        # MXU streams operand tiles instead of pinning an HxH value in vregs
        # (matters at production H; free at H=32).
        return jnp.tanh(
            proj_ref[t]
            + jnp.dot(h, whh_ref[...], preferred_element_type=jnp.float32))

    # fori_loop with a small partial unroll bounds the live set to ~one
    # (B_pad, H) tile while keeping LLO scheduling visibility, so chunk_t can
    # be raised far past 32 without vreg spills or compile-time blow-up.
    hid_ref[...] = lax.fori_loop(0, chunk_t, step, hid_ref[...],
                                 unroll=min(8, chunk_t))


def _pick_time_chunk(T, B_pad, H, vmem_budget_bytes=8 << 20):
    """Timesteps per grid step: whole sequence if its (double-buffered) proj
    stream fits a conservative VMEM budget, else the largest divisor of T
    under the budget (cap 512 steps/chunk)."""
    bytes_per_step = 2 * B_pad * H * 4          # double-buffered f32 rows
    cap = max(1, min(512, vmem_budget_bytes // bytes_per_step))
    if T <= cap:
        return T
    # TODO(synk): long prime T degrades to tiny chunks here; handle a
    # remainder chunk via an SMEM per-chunk step count instead.
    for tt in range(cap, 0, -1):
        if T % tt == 0:
            return tt
    return 1


def simple_rnn_forward(x, hidden, params, *, chunk_t=None):
    """x: (B, T, I) f32, hidden: (1, B, H) f32.

    params (PyTorch convention):
      w_ih (H, I), w_hh (H, H), b_ih (H,), b_hh (H,), w_fc (O, H), b_fc (O,)
    Returns (out (B, O), hidden (1, B, H)) — identical to SimpleRNN.forward.
    """
    B, T, I = x.shape
    H = params["w_hh"].shape[0]

    B_pad = ((B + 7) // 8) * 8        # full f32 sublane group; padded rows stay 0

    # ---- Hoisted input projection (parallel over time, off the serial path).
    # One full-shape XLA matmul; result is time-major and lane-dense (last=H).
    b_rnn = (params["b_ih"] + params["b_hh"]).astype(jnp.float32)
    proj = jnp.einsum("bti,hi->tbh", x, params["w_ih"]) + b_rnn          # (T, B, H)
    proj = jnp.pad(proj, ((0, 0), (0, B_pad - B), (0, 0)))               # (T, B_pad, H)

    h0 = jnp.pad(hidden[0].astype(jnp.float32), ((0, B_pad - B), (0, 0)))
    whh_t = params["w_hh"].T.astype(jnp.float32)                          # (H, H)

    if chunk_t is None:
        chunk_t = _pick_time_chunk(T, B_pad, H)
    assert T % chunk_t == 0, (T, chunk_t)
    n_chunks = T // chunk_t

    # VMEM budget: double-buffered proj stream + (default double-buffered)
    # grid-invariant operands + the resident hidden block; kept well under
    # v7x's 64 MiB physical VMEM.
    vmem_needed = (2 * chunk_t * B_pad * H * 4
                   + 2 * (H * H + B_pad * H) * 4
                   + B_pad * H * 4)
    vmem_limit = int(min(max(2 * vmem_needed + (4 << 20), 16 << 20), 32 << 20))

    cost = pl.CostEstimate(
        flops=2 * B_pad * T * H * H,          # serial recurrence matmuls
        transcendentals=B_pad * T * H,        # tanh
        bytes_accessed=4 * (T * B_pad * H + H * H + 2 * B_pad * H),
    )

    hid_pad = pl.pallas_call(
        _rnn_recurrence_kernel,
        out_shape=jax.ShapeDtypeStruct((B_pad, H), jnp.float32),
        grid_spec=pltpu.PrefetchScalarGridSpec(
            num_scalar_prefetch=0,
            grid=(n_chunks,),
            in_specs=[
                # Time-major projection: the only per-chunk HBM stream.
                pl.BlockSpec((chunk_t, B_pad, H), lambda c: (c, 0, 0)),
                # Grid-invariant operands (constant index_map).
                # TODO(synk): at production H, single-buffer these via
                # pipeline_mode=pl.Buffered(1) to halve their VMEM footprint.
                pl.BlockSpec((B_pad, H), lambda c: (0, 0)),   # h0
                pl.BlockSpec((H, H), lambda c: (0, 0)),       # W_hh^T
            ],
            # Constant index_map => VMEM-resident accumulator across chunks;
            # doubles as the recurrent state (no scratch / extra copy).
            out_specs=pl.BlockSpec((B_pad, H), lambda c: (0, 0)),
        ),
        compiler_params=pltpu.CompilerParams(
            dimension_semantics=("arbitrary",),   # time is sequential
            vmem_limit_bytes=vmem_limit,
        ),
        cost_estimate=cost,
    )(proj, h0, whh_t)
    # TODO(synk): at production batch sizes add a leading "parallel" batch grid
    # axis (>=8 rows per core) so v7x's second TensorCore gets work; at B=2 it
    # is not applicable.

    hid = hid_pad[:B]                                                    # (B, H)
    # FC head in the wrapper: the lane-sparse (O=8) output never touches the
    # kernel store path, and W_fc / b_fc never occupy kernel VMEM.
    out = hid @ params["w_fc"].T + params["b_fc"]                        # (B, O)
    return out, hid[None]


def init_params(key, input_size, hidden_size, output_size):
    """Deterministic init matching PyTorch's default U(-1/sqrt(H), 1/sqrt(H))."""
    ks = jax.random.split(key, 6)
    bound = 1.0 / jnp.sqrt(hidden_size)
    u = lambda k, shape: jax.random.uniform(
        k, shape, jnp.float32, minval=-bound, maxval=bound)
    return {
        "w_ih": u(ks[0], (hidden_size, input_size)),
        "w_hh": u(ks[1], (hidden_size, hidden_size)),
        "b_ih": u(ks[2], (hidden_size,)),
        "b_hh": u(ks[3], (hidden_size,)),
        "w_fc": u(ks[4], (output_size, hidden_size)),
        "b_fc": u(ks[5], (output_size,)),
    }


def _reference_f32(x, hidden, params):
    """Pure-f32 JAX reference of the PyTorch forward."""
    h = hidden[0]
    T = x.shape[1]
    for t in range(T):
        h = jnp.tanh(x[:, t, :] @ params["w_ih"].T + params["b_ih"]
                     + h @ params["w_hh"].T + params["b_hh"])
    out = h @ params["w_fc"].T + params["b_fc"]
    return out, h[None]


if __name__ == "__main__":
    batch, seq, input_size, hidden_size, output_size = 2, 8, 4, 32, 8

    key = jax.random.PRNGKey(0)
    k_x, k_p = jax.random.split(key)

    x = jax.random.normal(k_x, (batch, seq, input_size), dtype=jnp.float32)
    hidden0 = jnp.zeros((1, batch, hidden_size), dtype=jnp.float32)  # init_hidden
    params = init_params(k_p, input_size, hidden_size, output_size)

    fwd = jax.jit(simple_rnn_forward)
    out, hidden = fwd(x, hidden0, params)
    jax.block_until_ready((out, hidden))

    assert out.shape == (batch, output_size)
    assert hidden.shape == (1, batch, hidden_size)

    # The kernel keeps the whole recurrence in f32 (no per-step bf16 casts),
    # so it tracks the PyTorch-equivalent f32 reference closely.
    out_ref, hid_ref = _reference_f32(x, hidden0, params)
    assert jnp.allclose(out, out_ref, atol=2e-2, rtol=2e-2), "output mismatch vs f32 ref"
    assert jnp.allclose(hidden, hid_ref, atol=2e-2, rtol=2e-2), "hidden mismatch vs f32 ref"

    print("KERNEL_OK")
</pallas_src>

<mosaic_0001>
module attributes {stable_mosaic.version = 11 : i64} {
  func.func @_rnn_recurrence_kernel(%arg0: i32, %arg1: memref<8x8x32xf32, #tpu.memory_space<vmem>>, %arg2: memref<8x32xf32, #tpu.memory_space<vmem>>, %arg3: memref<32x32xf32, #tpu.memory_space<vmem>>, %arg4: memref<8x32xf32, #tpu.memory_space<vmem>>) attributes {dimension_semantics = [#tpu.dimension_semantics<arbitrary>], iteration_bounds = array<i64: 1>, scalar_prefetch = 0 : i64, scratch_operands = 0 : i64, tpu.core_type = #tpu.core_type<tc>, window_params = [{transform_indices = @transform_0, window_bounds = array<i64: 8, 8, 32>}, {pipeline_mode = #tpu.pipeline_mode<synchronous>, transform_indices = @transform_1, window_bounds = array<i64: 8, 32>}, {pipeline_mode = #tpu.pipeline_mode<synchronous>, transform_indices = @transform_2, window_bounds = array<i64: 32, 32>}, {pipeline_mode = #tpu.pipeline_mode<synchronous>, transform_indices = @transform_3, window_bounds = array<i64: 8, 32>}]} {
    %c0_i32 = arith.constant 0 : i32
    %0 = arith.cmpi eq, %arg0, %c0_i32 : i32
    %1 = arith.extui %0 : i1 to i32
    %c0_i32_0 = arith.constant 0 : i32
    %2 = arith.cmpi ne, %1, %c0_i32_0 : i32
    scf.if %2 {
      %c0_44 = arith.constant 0 : index
      %c0_45 = arith.constant 0 : index
      %61 = vector.load %arg2[%c0_44, %c0_45] : memref<8x32xf32, #tpu.memory_space<vmem>>, vector<8x32xf32>
      %c0_46 = arith.constant 0 : index
      %c0_47 = arith.constant 0 : index
      %62 = vector.load %arg4[%c0_46, %c0_47] : memref<8x32xf32, #tpu.memory_space<vmem>>, vector<8x32xf32>
      tpu.vector_store %arg4[%c0_46, %c0_47], %61 {strides = array<i32>} : memref<8x32xf32, #tpu.memory_space<vmem>>, vector<8x32xf32>,
    } else {
    }
    %c0 = arith.constant 0 : index
    %c0_1 = arith.constant 0 : index
    %3 = vector.load %arg4[%c0, %c0_1] : memref<8x32xf32, #tpu.memory_space<vmem>>, vector<8x32xf32>
    %c0_i32_2 = arith.constant 0 : i32
    %4 = arith.index_cast %c0_i32_2 : i32 to index
    %c0_3 = arith.constant 0 : index
    %c0_4 = arith.constant 0 : index
    %5 = vector.load %arg1[%4, %c0_3, %c0_4] : memref<8x8x32xf32, #tpu.memory_space<vmem>>, vector<1x8x32xf32>
    %6 = vector.shape_cast %5 : vector<1x8x32xf32> to vector<8x32xf32>
    %c0_5 = arith.constant 0 : index
    %c0_6 = arith.constant 0 : index
    %7 = vector.load %arg3[%c0_5, %c0_6] : memref<32x32xf32, #tpu.memory_space<vmem>>, vector<32x32xf32>
    %cst = arith.constant dense<0.000000e+00> : vector<8x32xf32>
    %8 = tpu.matmul %3, %7, %cst {dimension_numbers = #tpu.dot_dimension_numbers<[1], [0], [0], [1], [0, 0, 1, 1], [], []>} : vector<8x32xf32>, vector<32x32xf32>, vector<8x32xf32> -> vector<8x32xf32>
    %9 = arith.addf %6, %8 : vector<8x32xf32>
    %10 = math.tanh %9 : vector<8x32xf32>
    %c1_i32 = arith.constant 1 : i32
    %11 = arith.index_cast %c1_i32 : i32 to index
    %c0_7 = arith.constant 0 : index
    %c0_8 = arith.constant 0 : index
    %12 = vector.load %arg1[%11, %c0_7, %c0_8] : memref<8x8x32xf32, #tpu.memory_space<vmem>>, vector<1x8x32xf32>
    %13 = vector.shape_cast %12 : vector<1x8x32xf32> to vector<8x32xf32>
    %c0_9 = arith.constant 0 : index
    %c0_10 = arith.constant 0 : index
    %14 = vector.load %arg3[%c0_9, %c0_10] : memref<32x32xf32, #tpu.memory_space<vmem>>, vector<32x32xf32>
    %cst_11 = arith.constant dense<0.000000e+00> : vector<8x32xf32>
    %15 = tpu.matmul %10, %14, %cst_11 {dimension_numbers = #tpu.dot_dimension_numbers<[1], [0], [0], [1], [0, 0, 1, 1], [], []>} : vector<8x32xf32>, vector<32x32xf32>, vector<8x32xf32> -> vector<8x32xf32>
    %16 = arith.addf %13, %15 : vector<8x32xf32>
    %17 = math.tanh %16 : vector<8x32xf32>
    %c2_i32 = arith.constant 2 : i32
    %18 = arith.index_cast %c2_i32 : i32 to index
    %c0_12 = arith.constant 0 : index
    %c0_13 = arith.constant 0 : index
    %19 = vector.load %arg1[%18, %c0_12, %c0_13] : memref<8x8x32xf32, #tpu.memory_space<vmem>>, vector<1x8x32xf32>
    %20 = vector.shape_cast %19 : vector<1x8x32xf32> to vector<8x32xf32>
    %c0_14 = arith.constant 0 : index
    %c0_15 = arith.constant 0 : index
    %21 = vector.load %arg3[%c0_14, %c0_15] : memref<32x32xf32, #tpu.memory_space<vmem>>, vector<32x32xf32>
    %cst_16 = arith.constant dense<0.000000e+00> : vector<8x32xf32>
    %22 = tpu.matmul %17, %21, %cst_16 {dimension_numbers = #tpu.dot_dimension_numbers<[1], [0], [0], [1], [0, 0, 1, 1], [], []>} : vector<8x32xf32>, vector<32x32xf32>, vector<8x32xf32> -> vector<8x32xf32>
    %23 = arith.addf %20, %22 : vector<8x32xf32>
    %24 = math.tanh %23 : vector<8x32xf32>
    %c3_i32 = arith.constant 3 : i32
    %25 = arith.index_cast %c3_i32 : i32 to index
    %c0_17 = arith.constant 0 : index
    %c0_18 = arith.constant 0 : index
    %26 = vector.load %arg1[%25, %c0_17, %c0_18] : memref<8x8x32xf32, #tpu.memory_space<vmem>>, vector<1x8x32xf32>
    %27 = vector.shape_cast %26 : vector<1x8x32xf32> to vector<8x32xf32>
    %c0_19 = arith.constant 0 : index
    %c0_20 = arith.constant 0 : index
    %28 = vector.load %arg3[%c0_19, %c0_20] : memref<32x32xf32, #tpu.memory_space<vmem>>, vector<32x32xf32>
    %cst_21 = arith.constant dense<0.000000e+00> : vector<8x32xf32>
    %29 = tpu.matmul %24, %28, %cst_21 {dimension_numbers = #tpu.dot_dimension_numbers<[1], [0], [0], [1], [0, 0, 1, 1], [], []>} : vector<8x32xf32>, vector<32x32xf32>, vector<8x32xf32> -> vector<8x32xf32>
    %30 = arith.addf %27, %29 : vector<8x32xf32>
    %31 = math.tanh %30 : vector<8x32xf32>
    %c4_i32 = arith.constant 4 : i32
    %32 = arith.index_cast %c4_i32 : i32 to index
    %c0_22 = arith.constant 0 : index
    %c0_23 = arith.constant 0 : index
    %33 = vector.load %arg1[%32, %c0_22, %c0_23] : memref<8x8x32xf32, #tpu.memory_space<vmem>>, vector<1x8x32xf32>
    %34 = vector.shape_cast %33 : vector<1x8x32xf32> to vector<8x32xf32>
    %c0_24 = arith.constant 0 : index
    %c0_25 = arith.constant 0 : index
    %35 = vector.load %arg3[%c0_24, %c0_25] : memref<32x32xf32, #tpu.memory_space<vmem>>, vector<32x32xf32>
    %cst_26 = arith.constant dense<0.000000e+00> : vector<8x32xf32>
    %36 = tpu.matmul %31, %35, %cst_26 {dimension_numbers = #tpu.dot_dimension_numbers<[1], [0], [0], [1], [0, 0, 1, 1], [], []>} : vector<8x32xf32>, vector<32x32xf32>, vector<8x32xf32> -> vector<8x32xf32>
    %37 = arith.addf %34, %36 : vector<8x32xf32>
    %38 = math.tanh %37 : vector<8x32xf32>
    %c5_i32 = arith.constant 5 : i32
    %39 = arith.index_cast %c5_i32 : i32 to index
    %c0_27 = arith.constant 0 : index
    %c0_28 = arith.constant 0 : index
    %40 = vector.load %arg1[%39, %c0_27, %c0_28] : memref<8x8x32xf32, #tpu.memory_space<vmem>>, vector<1x8x32xf32>
    %41 = vector.shape_cast %40 : vector<1x8x32xf32> to vector<8x32xf32>
    %c0_29 = arith.constant 0 : index
    %c0_30 = arith.constant 0 : index
    %42 = vector.load %arg3[%c0_29, %c0_30] : memref<32x32xf32, #tpu.memory_space<vmem>>, vector<32x32xf32>
    %cst_31 = arith.constant dense<0.000000e+00> : vector<8x32xf32>
    %43 = tpu.matmul %38, %42, %cst_31 {dimension_numbers = #tpu.dot_dimension_numbers<[1], [0], [0], [1], [0, 0, 1, 1], [], []>} : vector<8x32xf32>, vector<32x32xf32>, vector<8x32xf32> -> vector<8x32xf32>
    %44 = arith.addf %41, %43 : vector<8x32xf32>
    %45 = math.tanh %44 : vector<8x32xf32>
    %c6_i32 = arith.constant 6 : i32
    %46 = arith.index_cast %c6_i32 : i32 to index
    %c0_32 = arith.constant 0 : index
    %c0_33 = arith.constant 0 : index
    %47 = vector.load %arg1[%46, %c0_32, %c0_33] : memref<8x8x32xf32, #tpu.memory_space<vmem>>, vector<1x8x32xf32>
    %48 = vector.shape_cast %47 : vector<1x8x32xf32> to vector<8x32xf32>
    %c0_34 = arith.constant 0 : index
    %c0_35 = arith.constant 0 : index
    %49 = vector.load %arg3[%c0_34, %c0_35] : memref<32x32xf32, #tpu.memory_space<vmem>>, vector<32x32xf32>
    %cst_36 = arith.constant dense<0.000000e+00> : vector<8x32xf32>
    %50 = tpu.matmul %45, %49, %cst_36 {dimension_numbers = #tpu.dot_dimension_numbers<[1], [0], [0], [1], [0, 0, 1, 1], [], []>} : vector<8x32xf32>, vector<32x32xf32>, vector<8x32xf32> -> vector<8x32xf32>
    %51 = arith.addf %48, %50 : vector<8x32xf32>
    %52 = math.tanh %51 : vector<8x32xf32>
    %c7_i32 = arith.constant 7 : i32
    %53 = arith.index_cast %c7_i32 : i32 to index
    %c0_37 = arith.constant 0 : index
    %c0_38 = arith.constant 0 : index
    %54 = vector.load %arg1[%53, %c0_37, %c0_38] : memref<8x8x32xf32, #tpu.memory_space<vmem>>, vector<1x8x32xf32>
    %55 = vector.shape_cast %54 : vector<1x8x32xf32> to vector<8x32xf32>
    %c0_39 = arith.constant 0 : index
    %c0_40 = arith.constant 0 : index
    %56 = vector.load %arg3[%c0_39, %c0_40] : memref<32x32xf32, #tpu.memory_space<vmem>>, vector<32x32xf32>
    %cst_41 = arith.constant dense<0.000000e+00> : vector<8x32xf32>
    %57 = tpu.matmul %52, %56, %cst_41 {dimension_numbers = #tpu.dot_dimension_numbers<[1], [0], [0], [1], [0, 0, 1, 1], [], []>} : vector<8x32xf32>, vector<32x32xf32>, vector<8x32xf32> -> vector<8x32xf32>
    %58 = arith.addf %55, %57 : vector<8x32xf32>
    %59 = math.tanh %58 : vector<8x32xf32>
    %c8_i32 = arith.constant 8 : i32
    %c0_42 = arith.constant 0 : index
    %c0_43 = arith.constant 0 : index
    %60 = vector.load %arg4[%c0_42, %c0_43] : memref<8x32xf32, #tpu.memory_space<vmem>>, vector<8x32xf32>
    tpu.vector_store %arg4[%c0_42, %c0_43], %59 {strides = array<i32>} : memref<8x32xf32, #tpu.memory_space<vmem>>, vector<8x32xf32>,
    return
  }
  func.func @transform_0(%arg0: i32) -> (i32, i32, i32) {
    %c0_i32 = arith.constant 0 : i32
    %c0_i32_0 = arith.constant 0 : i32
    %c0_i32_1 = arith.constant 0 : i32
    return %arg0, %c0_i32, %c0_i32_0 : i32, i32, i32
  }
  func.func @transform_1(%arg0: i32) -> (i32, i32) {
    %c0_i32 = arith.constant 0 : i32
    %c0_i32_0 = arith.constant 0 : i32
    %c0_i32_1 = arith.constant 0 : i32
    return %c0_i32, %c0_i32_0 : i32, i32
  }
  func.func @transform_2(%arg0: i32) -> (i32, i32) {
    %c0_i32 = arith.constant 0 : i32
    %c0_i32_0 = arith.constant 0 : i32
    %c0_i32_1 = arith.constant 0 : i32
    return %c0_i32, %c0_i32_0 : i32, i32
  }
  func.func @transform_3(%arg0: i32) -> (i32, i32) {
    %c0_i32 = arith.constant 0 : i32
    %c0_i32_0 = arith.constant 0 : i32
    %c0_i32_1 = arith.constant 0 : i32
    return %c0_i32, %c0_i32_0 : i32, i32
  }
}

</mosaic_0001>

<bundles_post_ra>
// kernel: simple_rnn_forward.1
= control target key start
LH: loop header
LB: loop body
LE: loop exit
PB: predicated region body
PF: predicated region fallthrough
CT: control target
= control target key end

     0   :  { %vm19_vm0 = vcmask 261120   ;;  %v857_v0 = vmov 0.0|0.0   ;;  %vm858_vm1 = vmmov 0   ;;  %v859_v4 = vmov 0.0   ;;  %s990_s2 = inlined_call_operand.vmem [shape: f32[32,32], index: 2, kind: input, shape index: {}]   ;;  %s991_s1 = inlined_call_operand.vmem [shape: f32[8,32], index: 1, kind: input, shape index: {}]   ;;  %s992_s3 = inlined_call_operand.vmem [shape: f32[8,32], index: 3, kind: output, shape index: {}]   ;;  %s993_s0 = inlined_call_operand.vmem [shape: f32[8,8,32], index: 0, kind: input, shape index: {}]  }
   0x1   :  { %790 = vmatprep.subr.bf16.mxu0 %v857_v0  ;;  %v23_v1 = vld [vmem:[%s990_s2] sm:$0xff]  ;;  %v24_v2 = vld [vmem:[%s990_s2 + $0x8] sm:$0xff]  ;;  %v25_v3 = vld [vmem:[%s990_s2 + $0x10] sm:$0xff]  ;;  %710 = vmatprep.mubr.msk.f32.mxu0 %vm858_vm1, %v859_v4 }
   0x2   :  { %v892_v5 = vpack.c.bf16 %v24_v2, %v23_v1  ;;  %v26_v6 = vld [vmem:[%s990_s2 + $0x18] sm:$0xff]  ;;  %v18_v7 = vld [vmem:[%s991_s1] sm:$0xff]  ;;  %796 = vmatprep.subr.bf16.mxu1 %v857_v0  ;;  %721 = vmatprep.mubr.msk.f32.mxu1 %vm858_vm1, %v859_v4  ;;  %v648_v15 = vld [vmem:[%s993_s0 + $0x8] sm:$0xff] }
   0x3   :  { %20 = vst.msk [vmem:[%s992_s3] sm:$0xff] %vm19_vm0, %v18_v7  ;;  %v908_v8 = vpack.c.bf16 %v26_v6, %v25_v3  ;;  %v22_v10 = vld [vmem:[%s993_s0] sm:$0xff]  ;;  %v650_v20 = vld [vmem:[%s993_s0 + $0x10] sm:$0xff]  ;;  %v652_v25 = vld [vmem:[%s993_s0 + $0x18] sm:$0xff] }
   0x4   :  { %792 = vmatpush3.bf16.msra.mxu0 %v892_v5  ;;  %798 = vmatpush3.bf16.msra.mxu1 %v892_v5  ;;  %v654_v30 = vld [vmem:[%s993_s0 + $0x20] sm:$0xff]  ;;  %v656_v35 = vld [vmem:[%s993_s0 + $0x28] sm:$0xff]  ;;  %v658_v40 = vld [vmem:[%s993_s0 + $0x30] sm:$0xff] }
   0x5   :  { %793 = vmatprep.subr.bf16.mxu0 %v857_v0  ;;  %799 = vmatprep.subr.bf16.mxu1 %v857_v0  ;;  %v660_v45 = vld [vmem:[%s993_s0 + $0x38] sm:$0xff] }
   0x8   :  { %795 = vmatpush3.bf16.msra.mxu0 %v908_v8  ;;  %801 = vmatpush3.bf16.msra.mxu1 %v908_v8 }
   0x9   :  { %802 = vmatprep.subr.bf16.mxu0 %v857_v0  ;;  %808 = vmatprep.subr.bf16.mxu1 %v857_v0 }
   0xa   :  { %v21_v9 = vld [vmem:[%s992_s3] sm:$0xff] }
   0xb   :  { %711 = vmatmul.mubr.msk.f32.vlgmr.msra.gmra.mrb[0].mxu0 %vm19_vm0, %v21_v9 }
   0xc   :  { %804 = vmatpush3.bf16.msra.mxu0 %v892_v5  ;;  %732 = vmatprep.mubr.msk.f32.mxu0 %vm858_vm1, %v859_v4 }
   0xd   :  { %805 = vmatprep.subr.bf16.mxu0 %v857_v0 }
  0x10   :  { %807 = vmatpush3.bf16.msra.mxu0 %v908_v8 }
  0x11   :  { %814 = vmatprep.subr.bf16.mxu0 %v857_v0 }
  0xde   :  { %v97_v11 = vpop.f32.mrb[0].mxu0 }
  0xdf   :  { %v101_v12 = vadd.f32 %v97_v11, %v22_v10  ;;  %v712_v13 = vpop.f32.mrb[1].mxu0 }
  0xe1   :  { %841 = vtanh.f32 %v101_v12 }
  0xeb   :  { %v842_v14 = vpop.eup %841 }
  0xec   :  { %722 = vmatmul.mubr.msk.f32.vlgmr.msra.gmra.mrb[0].mxu1 %vm19_vm0, %v842_v14 }
  0xed   :  { %810 = vmatpush3.bf16.msra.mxu1 %v892_v5  ;;  %743 = vmatprep.mubr.msk.f32.mxu1 %vm858_vm1, %v859_v4 }
  0xee   :  { %811 = vmatprep.subr.bf16.mxu1 %v857_v0 }
  0xf1   :  { %813 = vmatpush3.bf16.msra.mxu1 %v908_v8 }
  0xf2   :  { %820 = vmatprep.subr.bf16.mxu1 %v857_v0 }
 0x1bf   :  { %v174_v16 = vpop.f32.mrb[0].mxu1 }
 0x1c0   :  { %v178_v17 = vadd.f32 %v648_v15, %v174_v16  ;;  %v723_v18 = vpop.f32.mrb[1].mxu1 }
 0x1c2   :  { %843 = vtanh.f32 %v178_v17 }
 0x1cc   :  { %v844_v19 = vpop.eup %843 }
 0x1cd   :  { %733 = vmatmul.mubr.msk.f32.vlgmr.msra.gmra.mrb[2].mxu0 %vm19_vm0, %v844_v19 }
 0x1ce   :  { %816 = vmatpush3.bf16.msra.mxu0 %v892_v5  ;;  %754 = vmatprep.mubr.msk.f32.mxu0 %vm858_vm1, %v859_v4 }
 0x1cf   :  { %817 = vmatprep.subr.bf16.mxu0 %v857_v0 }
 0x1d2   :  { %819 = vmatpush3.bf16.msra.mxu0 %v908_v8 }
 0x1d3   :  { %826 = vmatprep.subr.bf16.mxu0 %v857_v0 }
 0x2a0   :  { %v251_v21 = vpop.f32.mrb[2].mxu0 }
 0x2a1   :  { %v255_v22 = vadd.f32 %v650_v20, %v251_v21  ;;  %v734_v23 = vpop.f32.mrb[3].mxu0 }
 0x2a3   :  { %845 = vtanh.f32 %v255_v22 }
 0x2ad   :  { %v846_v24 = vpop.eup %845 }
 0x2ae   :  { %744 = vmatmul.mubr.msk.f32.vlgmr.msra.gmra.mrb[2].mxu1 %vm19_vm0, %v846_v24 }
 0x2af   :  { %822 = vmatpush3.bf16.msra.mxu1 %v892_v5  ;;  %765 = vmatprep.mubr.msk.f32.mxu1 %vm858_vm1, %v859_v4 }
 0x2b0   :  { %823 = vmatprep.subr.bf16.mxu1 %v857_v0 }
 0x2b3   :  { %825 = vmatpush3.bf16.msra.mxu1 %v908_v8 }
 0x2b4   :  { %832 = vmatprep.subr.bf16.mxu1 %v857_v0 }
 0x381   :  { %v328_v26 = vpop.f32.mrb[2].mxu1 }
 0x382   :  { %v332_v27 = vadd.f32 %v652_v25, %v328_v26  ;;  %v745_v28 = vpop.f32.mrb[3].mxu1 }
 0x384   :  { %847 = vtanh.f32 %v332_v27 }
 0x38e   :  { %v848_v29 = vpop.eup %847 }
 0x38f   :  { %755 = vmatmul.mubr.msk.f32.vlgmr.msra.gmra.mrb[4].mxu0 %vm19_vm0, %v848_v29 }
 0x390   :  { %828 = vmatpush3.bf16.msra.mxu0 %v892_v5  ;;  %776 = vmatprep.mubr.msk.f32.mxu0 %vm858_vm1, %v859_v4 }
 0x391   :  { %829 = vmatprep.subr.bf16.mxu0 %v857_v0 }
 0x394   :  { %831 = vmatpush3.bf16.msra.mxu0 %v908_v8 }
 0x462   :  { %v405_v31 = vpop.f32.mrb[4].mxu0 }
 0x463   :  { %v409_v32 = vadd.f32 %v654_v30, %v405_v31  ;;  %v756_v33 = vpop.f32.mrb[5].mxu0 }
 0x465   :  { %849 = vtanh.f32 %v409_v32 }
 0x46f   :  { %v850_v34 = vpop.eup %849 }
 0x470   :  { %766 = vmatmul.mubr.msk.f32.vlgmr.msra.gmra.mrb[4].mxu1 %vm19_vm0, %v850_v34 }
 0x471   :  { %834 = vmatpush3.bf16.msra.mxu1 %v892_v5  ;;  %787 = vmatprep.mubr.msk.f32.mxu1 %vm858_vm1, %v859_v4 }
 0x472   :  { %835 = vmatprep.subr.bf16.mxu1 %v857_v0 }
 0x475   :  { %837 = vmatpush3.bf16.msra.mxu1 %v908_v8 }
 0x543   :  { %v482_v36 = vpop.f32.mrb[4].mxu1 }
 0x544   :  { %v486_v37 = vadd.f32 %v656_v35, %v482_v36  ;;  %v767_v38 = vpop.f32.mrb[5].mxu1 }
 0x546   :  { %851 = vtanh.f32 %v486_v37 }
 0x550   :  { %v852_v39 = vpop.eup %851 }
 0x551   :  { %777 = vmatmul.mubr.msk.f32.vlgmr.msra.gmra.mrb[6].mxu0 %vm19_vm0, %v852_v39 }
 0x624   :  { %v559_v41 = vpop.f32.mrb[6].mxu0 }
 0x625   :  { %v563_v42 = vadd.f32 %v658_v40, %v559_v41  ;;  %v778_v43 = vpop.f32.mrb[7].mxu0 }
 0x627   :  { %853 = vtanh.f32 %v563_v42 }
 0x631   :  { %v854_v44 = vpop.eup %853 }
 0x632   :  { %788 = vmatmul.mubr.msk.f32.vlgmr.msra.gmra.mrb[6].mxu1 %vm19_vm0, %v854_v44 }
 0x705   :  { %v636_v46 = vpop.f32.mrb[6].mxu1 }
 0x706   :  { %v640_v47 = vadd.f32 %v660_v45, %v636_v46  ;;  %v789_v48 = vpop.f32.mrb[7].mxu1 }
 0x708   :  { %855 = vtanh.f32 %v640_v47 }
 0x712   :  { %v856_v49 = vpop.eup %855 }
 0x713   :  { %642 = vst.msk [vmem:[%s992_s3] sm:$0xff] %vm19_vm0, %v856_v49 }

</bundles_post_ra>
